<compile_context>
chip_gen: v7x
topology: tpu7x:2x2x1
jax: 0.10.0
libtpu: 0.0.40
codegen_flags: <defaults>
</compile_context>

<pallas_src>
import functools

import numpy as np
import jax
import jax.numpy as jnp
from jax import lax
from jax.experimental import pallas as pl
from jax.experimental.pallas import tpu as pltpu


def _sinkhorn_kernel(x_ref, y_ref, ysq_ref, o_ref, *scratch,
                     p, inv_lbda, neg_lbda, u_plus, log_u, v_plus,
                     n_valid, tile_n, padded, apply_updates, stabilize,
                     mm_precision, d_chunk):
    # x_ref  : (TN, D)  tile of x rows for this (batch, n-tile)
    # y_ref  : (M, D)   all y points for this batch element
    # ysq_ref: (1, M)   precomputed ||y_j||^2 (lane-major row)
    # o_ref  : (1, 1)   per-batch Sinkhorn loss
    # scratch: (1, M) f32 column accumulators carried across n-tiles
    if stabilize:
        m_sc, s_sc, w_sc = scratch
    else:
        s_sc, w_sc = scratch
        m_sc = None

    nt = pl.program_id(1)
    last = pl.num_programs(1) - 1

    @pl.when(nt == 0)
    def _init():
        if stabilize:
            m_sc[...] = jnp.full_like(m_sc, -jnp.inf)
        s_sc[...] = jnp.zeros_like(s_sc)
        w_sc[...] = jnp.zeros_like(w_sc)

    x = x_ref[...].astype(jnp.float32)          # (TN, D)
    y = y_ref[...].astype(jnp.float32)          # (M, D)
    tn, d = x.shape
    m = y.shape[0]

    if padded:
        row_ids = nt * tile_n + lax.broadcasted_iota(jnp.int32, (tn, 1), 0)
        row_valid = row_ids < n_valid           # (TN, 1) mask of real rows
    else:
        row_valid = None

    # ------------- neg_cs = -cost / lbda, shape (TN, M) -------------
    if p == 2:
        # MXU path: ||x - y||^2 = ||x||^2 + ||y||^2 - 2 x.y^T, fused with the
        # -1/lbda scale so no (TN, M) `cost` buffer stays live.
        xy = lax.dot_general(x, y, (((1,), (1,)), ((), ())),
                             precision=mm_precision,
                             preferred_element_type=jnp.float32)      # (TN, M)
        xn = jnp.sum(x * x, axis=1, keepdims=True)                    # (TN, 1)
        yn = ysq_ref[...].astype(jnp.float32)                         # (1, M)
        neg_cs = jnp.minimum((2.0 * xy - xn - yn) * jnp.float32(inv_lbda), 0.0)
    else:
        # Fallback for p != 2: chunk the D axis to bound the 3-D temporary.
        cost = jnp.zeros((tn, m), jnp.float32)
        for d0 in range(0, d, d_chunk):
            d1 = min(d0 + d_chunk, d)
            diff = jnp.abs(x[:, None, d0:d1] - y[None, :, d0:d1])     # (TN,M,dc)
            if p == 1:
                cost = cost + jnp.sum(diff, axis=-1)
            elif float(p) == float(int(p)):
                cost = cost + jnp.sum(diff ** int(p), axis=-1)
            else:
                cost = cost + jnp.sum(diff ** jnp.float32(p), axis=-1)
        neg_cs = cost * jnp.float32(-inv_lbda)

    ones_tn = jnp.ones((1, tn), jnp.float32)
    ones_m = jnp.ones((m, 1), jnp.float32)

    if apply_updates:
        # r update per row: r_i / lbda = log(u + 1e-10) - logsumexp_j(neg_cs_ij)
        m_r = jnp.max(neg_cs, axis=1, keepdims=True)                  # (TN, 1)
        p_row = jnp.exp(neg_cs - m_r)             # the ONLY full (TN, M) exp
        # Row sum via MXU instead of an XLU lane reduce.
        rowsum = jnp.dot(p_row, ones_m, precision=lax.Precision.HIGHEST,
                         preferred_element_type=jnp.float32)          # (TN, 1)

        if not stabilize:
            # exp(s_ij) = p_row_ij * g_i,  g_i = u_plus / rowsum_i <= u_plus,
            # so unstabilized column sums cannot overflow.
            g = jnp.float32(u_plus) / rowsum                          # (TN, 1)
            if row_valid is not None:
                g = jnp.where(row_valid, g, 0.0)
            e = p_row * g                                             # (TN, M)
            ew = e * neg_cs                                           # (TN, M)
            # Column sums via MXU (ones(1,TN) @ ...), accumulated across tiles.
            s_sc[...] = s_sc[...] + jnp.dot(
                ones_tn, e, precision=lax.Precision.HIGHEST,
                preferred_element_type=jnp.float32)
            w_sc[...] = w_sc[...] + jnp.dot(
                ones_tn, ew, precision=lax.Precision.HIGHEST,
                preferred_element_type=jnp.float32)
        else:
            # Flagged online-column-max path for extreme cost/lbda regimes.
            lse_r = m_r + jnp.log(rowsum)
            s = neg_cs + (jnp.float32(log_u) - lse_r)                 # (TN, M)
            if row_valid is not None:
                s = jnp.where(row_valid, s, -jnp.inf)
            tile_max = jnp.max(s, axis=0, keepdims=True)              # (1, M)
            m_new = jnp.maximum(m_sc[...], tile_max)
            alpha = jnp.exp(m_sc[...] - m_new)
            e = jnp.exp(s - m_new)                                    # 2nd exp
            ew = e * neg_cs
            s_sc[...] = alpha * s_sc[...] + jnp.dot(
                ones_tn, e, precision=lax.Precision.HIGHEST,
                preferred_element_type=jnp.float32)
            w_sc[...] = alpha * w_sc[...] + jnp.dot(
                ones_tn, ew, precision=lax.Precision.HIGHEST,
                preferred_element_type=jnp.float32)
            m_sc[...] = m_new

        @pl.when(nt == last)
        def _fin():
            # loss_b = v_plus * sum_j (sum_i exp(s) * D) / (sum_i exp(s))
            #        = v_plus * (-lbda) * sum_j W_j / S_j
            ratio = w_sc[...] / s_sc[...]                             # (1, M)
            o_ref[...] = jnp.float32(v_plus * neg_lbda) * jnp.sum(
                ratio, axis=1, keepdims=True)
    else:
        # max_iter < 1: r = c = 0  ->  loss = sum_ij exp(neg_cs) * D
        e = jnp.exp(neg_cs)
        if row_valid is not None:
            e = jnp.where(row_valid, e, 0.0)
        w_sc[...] = w_sc[...] + jnp.dot(
            ones_tn, e * neg_cs, precision=lax.Precision.HIGHEST,
            preferred_element_type=jnp.float32)

        @pl.when(nt == last)
        def _fin():
            o_ref[...] = jnp.float32(neg_lbda) * jnp.sum(
                w_sc[...], axis=1, keepdims=True)


def _cdiv(a, b):
    return -(-a // b)


def _vmem_capacity_bytes():
    try:
        return int(pltpu.get_tpu_info().vmem_capacity_bytes)
    except Exception:
        return 64 * 1024 * 1024        # conservative (v7x-sized) fallback


def _plan_tiles(n, m, d, p, vmem_cap):
    """Pick (tile_n, n_pad, d_chunk, vmem_limit_bytes) for the N-tiled grid."""
    lanes_m = max(128, _cdiv(m, 128) * 128)     # lane padding of (*, M) tiles
    sub_m = max(8, _cdiv(m, 8) * 8)             # sublane padding of (M, *)
    lanes_d = max(128, _cdiv(d, 128) * 128)     # lane padding of (*, D) tiles

    # Fixed VMEM (bytes): double-buffered y block, ysq row, output, scratches.
    fixed = (2 * sub_m * lanes_d * 4            # y (M, D) x 2 buffers
             + 2 * 8 * lanes_m * 4              # ysq (1, M) x 2 buffers
             + 2 * 8 * 128 * 4                  # out (1, 1) x 2 buffers
             + 3 * 8 * lanes_m * 4)             # three (1, M) f32 scratches

    # Per-row VMEM: double-buffered x row + live (row, M) f32 temporaries.
    d_chunk = d
    per_row = 2 * lanes_d * 4 + 6 * lanes_m * 4
    if p != 2:
        d_chunk = min(d, 128)
        per_row += 2 * sub_m * 128 * 4          # chunked (TN, M, dc) broadcast

    budget = int(vmem_cap * 0.6) - fixed
    # v5e/v6e (128 MiB VMEM): allow up to 1024 rows; v7x (64 MiB): cap at 256.
    hw_cap = 1024 if vmem_cap >= 96 * 1024 * 1024 else 256
    if budget > per_row * 8:
        rows = max(8, min(hw_cap, (budget // per_row) // 8 * 8))
    else:
        rows = 8

    n_tiles = _cdiv(n, rows)
    tile_n = 8 * _cdiv(_cdiv(n, n_tiles), 8)    # multiple of 8, <= rows
    n_pad = tile_n * n_tiles
    vmem_limit = int(vmem_cap * 3 // 4)
    return tile_n, n_pad, d_chunk, vmem_limit


def sinkhorn_divergence_loss(distrib_x, distrib_y, *, lbda, max_iter, p=2,
                             reduction=None, stabilize=False):
    x = jnp.asarray(distrib_x, jnp.float32)
    y = jnp.asarray(distrib_y, jnp.float32)

    squeezed = x.ndim == 2                 # mirror the torch batch_size==1 path
    if squeezed:
        x, y = x[None], y[None]

    B, N, D = x.shape
    M = y.shape[1]

    # Precompute ||y_j||^2 once per batch element as a lane-major (1, M) row.
    ysq = jnp.sum(y * y, axis=-1)[:, None, :]                  # (B, 1, M)

    vmem_cap = _vmem_capacity_bytes()
    tile_n, n_pad, d_chunk, vmem_limit = _plan_tiles(N, M, D, p, vmem_cap)
    if n_pad != N:
        x = jnp.pad(x, ((0, 0), (0, n_pad - N), (0, 0)))
    n_tiles = n_pad // tile_n

    # The reference loop early-stops after one iteration (u never changes).
    apply_updates = max_iter >= 1
    u_plus = float(np.float32(1.0 / N) + np.float32(1e-10))
    log_u = float(np.log(np.float32(1.0 / N) + np.float32(1e-10)))
    v_plus = float(np.float32(1.0 / M) + np.float32(1e-10))

    mm_precision = (lax.Precision.HIGHEST if D < 256
                    else lax.Precision.DEFAULT)

    kernel = functools.partial(
        _sinkhorn_kernel, p=p, inv_lbda=1.0 / float(lbda),
        neg_lbda=-float(lbda), u_plus=u_plus, log_u=log_u, v_plus=v_plus,
        n_valid=N, tile_n=tile_n, padded=(n_pad != N),
        apply_updates=apply_updates, stabilize=bool(stabilize),
        mm_precision=mm_precision, d_chunk=d_chunk)

    scratch_shapes = [pltpu.VMEM((1, M), jnp.float32),   # sum_i exp(s)
                      pltpu.VMEM((1, M), jnp.float32)]   # sum_i exp(s)*neg_cs
    if stabilize:
        scratch_shapes = [pltpu.VMEM((1, M), jnp.float32)] + scratch_shapes

    flops = 2 * B * n_pad * M * (D + 4)
    transc = B * n_pad * (M + 2) * (2 if stabilize else 1)
    bytes_acc = 4 * B * (n_pad * D + M * D + M + 1)

    out = pl.pallas_call(
        kernel,
        out_shape=jax.ShapeDtypeStruct((B, 1, 1), jnp.float32),
        grid_spec=pltpu.PrefetchScalarGridSpec(
            num_scalar_prefetch=0,
            grid=(B, n_tiles),
            in_specs=[
                pl.BlockSpec((None, tile_n, D), lambda b, n: (b, n, 0)),  # x
                pl.BlockSpec((None, M, D), lambda b, n: (b, 0, 0)),       # y
                pl.BlockSpec((None, 1, M), lambda b, n: (b, 0, 0)),       # |y|^2
            ],
            out_specs=pl.BlockSpec((None, 1, 1), lambda b, n: (b, 0, 0)),
            scratch_shapes=scratch_shapes),
        compiler_params=pltpu.CompilerParams(
            dimension_semantics=("parallel", "arbitrary"),
            vmem_limit_bytes=int(vmem_limit)),
        cost_estimate=pl.CostEstimate(
            flops=int(flops), transcendentals=int(transc),
            bytes_accessed=int(bytes_acc)),
    )(x, y, ysq)

    loss = out[:, 0, 0]                    # [B]
    if squeezed:
        loss = loss[0]
    if reduction == 'mean':
        loss = jnp.mean(loss)
    return loss


def _reference(x, y, *, lbda, max_iter, p):
    """Pure-JAX transcription of the PyTorch forward (for verification)."""
    x = jnp.asarray(x, jnp.float32)
    y = jnp.asarray(y, jnp.float32)
    D = jnp.sum(jnp.abs(x[:, :, None, :] - y[:, None, :, :]) ** p, axis=-1)
    B, n, m = D.shape
    u = jnp.full((B, n), 1.0 / n, jnp.float32)
    v = jnp.full((B, m), 1.0 / m, jnp.float32)
    K = -D
    r = jnp.zeros_like(u)
    c = jnp.zeros_like(v)
    for _ in range(min(max_iter, 1)):   # reference breaks after first iteration
        r = r + lbda * (jnp.log(u + 1e-10) - jax.scipy.special.logsumexp(
            (r[:, :, None] + K + c[:, None, :]) / lbda, axis=-1))
        c = c + lbda * (jnp.log(v + 1e-10) - jax.scipy.special.logsumexp(
            (r[:, :, None] + K + c[:, None, :]) / lbda, axis=-2))
    T = jnp.exp((r[:, :, None] + K + c[:, None, :]) / lbda)
    return jnp.sum(T * D, axis=(-2, -1))


if __name__ == "__main__":
    key = jax.random.PRNGKey(0)
    kx, ky, kx2, ky2 = jax.random.split(key, 4)

    lbda, max_iter, p = 1.0, 100, 2

    # Case 1: batched demo shape, fast (single-exp, unstabilized) path.
    B, N, M, Dd = 2, 8, 16, 4
    x1 = jax.random.normal(kx, (B, N, Dd), jnp.float32)
    y1 = jax.random.normal(ky, (B, M, Dd), jnp.float32)
    out1 = jax.block_until_ready(
        sinkhorn_divergence_loss(x1, y1, lbda=lbda, max_iter=max_iter, p=p))
    ref1 = jax.block_until_ready(
        _reference(x1, y1, lbda=lbda, max_iter=max_iter, p=p))
    if not np.allclose(np.asarray(out1), np.asarray(ref1), rtol=1e-3, atol=1e-3):
        raise AssertionError(f"fast-path mismatch: kernel={out1} ref={ref1}")

    # Case 2: stabilized (online column max) path on the same data.
    out2 = jax.block_until_ready(
        sinkhorn_divergence_loss(x1, y1, lbda=lbda, max_iter=max_iter, p=p,
                                 stabilize=True))
    if not np.allclose(np.asarray(out2), np.asarray(ref1), rtol=1e-3, atol=1e-3):
        raise AssertionError(f"stabilized-path mismatch: kernel={out2} ref={ref1}")

    # Case 3: awkward N (row padding + in-kernel mask) and 'mean' reduction.
    B3, N3, M3, D3 = 1, 12, 16, 4
    x3 = jax.random.normal(kx2, (B3, N3, D3), jnp.float32)
    y3 = jax.random.normal(ky2, (B3, M3, D3), jnp.float32)
    out3 = jax.block_until_ready(
        sinkhorn_divergence_loss(x3, y3, lbda=lbda, max_iter=max_iter, p=p,
                                 reduction='mean'))
    ref3 = jax.block_until_ready(
        jnp.mean(_reference(x3, y3, lbda=lbda, max_iter=max_iter, p=p)))
    if not np.allclose(np.asarray(out3), np.asarray(ref3), rtol=1e-3, atol=1e-3):
        raise AssertionError(f"padded-N mismatch: kernel={out3} ref={ref3}")

    print("KERNEL_OK")
</pallas_src>

<mosaic_0001>
module attributes {stable_mosaic.version = 11 : i64} {
  func.func @_sinkhorn_kernel(%arg0: i32, %arg1: i32, %arg2: memref<1x8x4xf32, #tpu.memory_space<vmem>>, %arg3: memref<1x16x4xf32, #tpu.memory_space<vmem>>, %arg4: memref<1x1x16xf32, #tpu.memory_space<vmem>>, %arg5: memref<1x1x1xf32, #tpu.memory_space<vmem>>, %arg6: memref<1x16xf32, #tpu.memory_space<vmem>>, %arg7: memref<1x16xf32, #tpu.memory_space<vmem>>) attributes {dimension_semantics = [#tpu.dimension_semantics<parallel>, #tpu.dimension_semantics<arbitrary>], iteration_bounds = array<i64: 2, 1>, scalar_prefetch = 0 : i64, scratch_operands = 2 : i64, tpu.core_type = #tpu.core_type<tc>, window_params = [{transform_indices = @transform_0, window_bounds = array<i64: 1, 8, 4>}, {transform_indices = @transform_1, window_bounds = array<i64: 1, 16, 4>}, {transform_indices = @transform_2, window_bounds = array<i64: 1, 1, 16>}, {transform_indices = @transform_3, window_bounds = array<i64: 1, 1, 1>}]} {
    %c0_i32 = arith.constant 0 : i32
    %0 = arith.cmpi eq, %arg1, %c0_i32 : i32
    %1 = arith.extui %0 : i1 to i32
    %c0_i32_0 = arith.constant 0 : i32
    %2 = arith.cmpi ne, %1, %c0_i32_0 : i32
    scf.if %2 {
      %cst_30 = arith.constant 0.000000e+00 : f32
      %47 = vector.broadcast %cst_30 : f32 to vector<1x16xf32>
      %c0_31 = arith.constant 0 : index
      %c0_32 = arith.constant 0 : index
      %48 = vector.load %arg6[%c0_31, %c0_32] : memref<1x16xf32, #tpu.memory_space<vmem>>, vector<1x16xf32>
      tpu.vector_store %arg6[%c0_31, %c0_32], %47 {strides = array<i32>} : memref<1x16xf32, #tpu.memory_space<vmem>>, vector<1x16xf32>,
      %cst_33 = arith.constant 0.000000e+00 : f32
      %49 = vector.broadcast %cst_33 : f32 to vector<1x16xf32>
      %c0_34 = arith.constant 0 : index
      %c0_35 = arith.constant 0 : index
      %50 = vector.load %arg7[%c0_34, %c0_35] : memref<1x16xf32, #tpu.memory_space<vmem>>, vector<1x16xf32>
      tpu.vector_store %arg7[%c0_34, %c0_35], %49 {strides = array<i32>} : memref<1x16xf32, #tpu.memory_space<vmem>>, vector<1x16xf32>,
    } else {
    }
    %c0 = arith.constant 0 : index
    %c0_1 = arith.constant 0 : index
    %c0_2 = arith.constant 0 : index
    %3 = vector.load %arg2[%c0, %c0_1, %c0_2] : memref<1x8x4xf32, #tpu.memory_space<vmem>>, vector<1x8x4xf32>
    %4 = vector.shape_cast %3 : vector<1x8x4xf32> to vector<8x4xf32>
    %c0_3 = arith.constant 0 : index
    %c0_4 = arith.constant 0 : index
    %c0_5 = arith.constant 0 : index
    %5 = vector.load %arg3[%c0_3, %c0_4, %c0_5] : memref<1x16x4xf32, #tpu.memory_space<vmem>>, vector<1x16x4xf32>
    %6 = vector.shape_cast %5 : vector<1x16x4xf32> to vector<16x4xf32>
    %cst = arith.constant dense<0.000000e+00> : vector<8x16xf32>
    %7 = tpu.matmul %4, %6, %cst {dimension_numbers = #tpu.dot_dimension_numbers<[1], [1], [0], [0], [0, 0, 1, 0], [], []>, precision = #tpu.contract_precision<fp32>} : vector<8x4xf32>, vector<16x4xf32>, vector<8x16xf32> -> vector<8x16xf32>
    %8 = arith.mulf %4, %4 : vector<8x4xf32>
    %cst_6 = arith.constant dense<0.000000e+00> : vector<8xf32>
    %9 = vector.multi_reduction <add>, %8, %cst_6 [1] : vector<8x4xf32> to vector<8xf32>
    %10 = vector.shape_cast %9 : vector<8xf32> to vector<8x1xf32>
    %c0_7 = arith.constant 0 : index
    %c0_8 = arith.constant 0 : index
    %c0_9 = arith.constant 0 : index
    %11 = vector.load %arg4[%c0_7, %c0_8, %c0_9] : memref<1x1x16xf32, #tpu.memory_space<vmem>>, vector<1x1x16xf32>
    %12 = vector.shape_cast %11 : vector<1x1x16xf32> to vector<1x16xf32>
    %cst_10 = arith.constant 2.000000e+00 : f32
    %13 = vector.broadcast %cst_10 : f32 to vector<8x16xf32>
    %14 = arith.mulf %13, %7 : vector<8x16xf32>
    %15 = vector.broadcast %10 : vector<8x1xf32> to vector<8x16xf32>
    %16 = arith.subf %14, %15 : vector<8x16xf32>
    %17 = vector.broadcast %12 : vector<1x16xf32> to vector<8x16xf32>
    %18 = arith.subf %16, %17 : vector<8x16xf32>
    %cst_11 = arith.constant 1.000000e+00 : f32
    %19 = vector.broadcast %cst_11 : f32 to vector<8x16xf32>
    %20 = arith.mulf %18, %19 : vector<8x16xf32>
    %cst_12 = arith.constant 0.000000e+00 : f32
    %21 = vector.broadcast %cst_12 : f32 to vector<8x16xf32>
    %22 = arith.minimumf %20, %21 : vector<8x16xf32>
    %cst_13 = arith.constant 1.000000e+00 : f32
    %23 = vector.broadcast %cst_13 : f32 to vector<1x8xf32>
    %cst_14 = arith.constant 1.000000e+00 : f32
    %24 = vector.broadcast %cst_14 : f32 to vector<16x1xf32>
    %cst_15 = arith.constant dense<0xFF800000> : vector<8xf32>
    %25 = vector.multi_reduction <maximumf>, %22, %cst_15 [1] : vector<8x16xf32> to vector<8xf32>
    %26 = vector.shape_cast %25 : vector<8xf32> to vector<8x1xf32>
    %27 = vector.broadcast %26 : vector<8x1xf32> to vector<8x16xf32>
    %28 = arith.subf %22, %27 : vector<8x16xf32>
    %29 = math.exp %28 : vector<8x16xf32>
    %cst_16 = arith.constant dense<0.000000e+00> : vector<8x1xf32>
    %30 = tpu.matmul %29, %24, %cst_16 {dimension_numbers = #tpu.dot_dimension_numbers<[1], [0], [0], [1], [0, 0, 1, 1], [], []>, precision = #tpu.contract_precision<fp32>} : vector<8x16xf32>, vector<16x1xf32>, vector<8x1xf32> -> vector<8x1xf32>
    %cst_17 = arith.constant 1.250000e-01 : f32
    %31 = vector.broadcast %cst_17 : f32 to vector<8x1xf32>
    %32 = arith.divf %31, %30 : vector<8x1xf32>
    %33 = vector.broadcast %32 : vector<8x1xf32> to vector<8x16xf32>
    %34 = arith.mulf %29, %33 : vector<8x16xf32>
    %35 = arith.mulf %34, %22 : vector<8x16xf32>
    %c0_18 = arith.constant 0 : index
    %c0_19 = arith.constant 0 : index
    %36 = vector.load %arg6[%c0_18, %c0_19] : memref<1x16xf32, #tpu.memory_space<vmem>>, vector<1x16xf32>
    %cst_20 = arith.constant dense<0.000000e+00> : vector<1x16xf32>
    %37 = tpu.matmul %23, %34, %cst_20 {dimension_numbers = #tpu.dot_dimension_numbers<[1], [0], [0], [1], [0, 0, 1, 1], [], []>, precision = #tpu.contract_precision<fp32>} : vector<1x8xf32>, vector<8x16xf32>, vector<1x16xf32> -> vector<1x16xf32>
    %38 = arith.addf %36, %37 : vector<1x16xf32>
    %c0_21 = arith.constant 0 : index
    %c0_22 = arith.constant 0 : index
    %39 = vector.load %arg6[%c0_21, %c0_22] : memref<1x16xf32, #tpu.memory_space<vmem>>, vector<1x16xf32>
    tpu.vector_store %arg6[%c0_21, %c0_22], %38 {strides = array<i32>} : memref<1x16xf32, #tpu.memory_space<vmem>>, vector<1x16xf32>,
    %c0_23 = arith.constant 0 : index
    %c0_24 = arith.constant 0 : index
    %40 = vector.load %arg7[%c0_23, %c0_24] : memref<1x16xf32, #tpu.memory_space<vmem>>, vector<1x16xf32>
    %cst_25 = arith.constant dense<0.000000e+00> : vector<1x16xf32>
    %41 = tpu.matmul %23, %35, %cst_25 {dimension_numbers = #tpu.dot_dimension_numbers<[1], [0], [0], [1], [0, 0, 1, 1], [], []>, precision = #tpu.contract_precision<fp32>} : vector<1x8xf32>, vector<8x16xf32>, vector<1x16xf32> -> vector<1x16xf32>
    %42 = arith.addf %40, %41 : vector<1x16xf32>
    %c0_26 = arith.constant 0 : index
    %c0_27 = arith.constant 0 : index
    %43 = vector.load %arg7[%c0_26, %c0_27] : memref<1x16xf32, #tpu.memory_space<vmem>>, vector<1x16xf32>
    tpu.vector_store %arg7[%c0_26, %c0_27], %42 {strides = array<i32>} : memref<1x16xf32, #tpu.memory_space<vmem>>, vector<1x16xf32>,
    %c0_i32_28 = arith.constant 0 : i32
    %44 = arith.cmpi eq, %arg1, %c0_i32_28 : i32
    %45 = arith.extui %44 : i1 to i32
    %c0_i32_29 = arith.constant 0 : i32
    %46 = arith.cmpi ne, %45, %c0_i32_29 : i32
    scf.if %46 {
      %c0_30 = arith.constant 0 : index
      %c0_31 = arith.constant 0 : index
      %47 = vector.load %arg7[%c0_30, %c0_31] : memref<1x16xf32, #tpu.memory_space<vmem>>, vector<1x16xf32>
      %c0_32 = arith.constant 0 : index
      %c0_33 = arith.constant 0 : index
      %48 = vector.load %arg6[%c0_32, %c0_33] : memref<1x16xf32, #tpu.memory_space<vmem>>, vector<1x16xf32>
      %49 = arith.divf %47, %48 : vector<1x16xf32>
      %cst_34 = arith.constant dense<0.000000e+00> : vector<1xf32>
      %50 = vector.multi_reduction <add>, %49, %cst_34 [1] : vector<1x16xf32> to vector<1xf32>
      %51 = vector.shape_cast %50 : vector<1xf32> to vector<1x1xf32>
      %cst_35 = arith.constant -6.250000e-02 : f32
      %52 = vector.broadcast %cst_35 : f32 to vector<1x1xf32>
      %53 = arith.mulf %52, %51 : vector<1x1xf32>
      %c0_36 = arith.constant 0 : index
      %c0_37 = arith.constant 0 : index
      %c0_38 = arith.constant 0 : index
      %54 = vector.load %arg5[%c0_36, %c0_37, %c0_38] : memref<1x1x1xf32, #tpu.memory_space<vmem>>, vector<1x1x1xf32>
      %55 = vector.shape_cast %54 : vector<1x1x1xf32> to vector<1x1xf32>
      %56 = vector.shape_cast %53 : vector<1x1xf32> to vector<1x1x1xf32>
      tpu.vector_store %arg5[%c0_36, %c0_37, %c0_38], %56 {strides = array<i32>} : memref<1x1x1xf32, #tpu.memory_space<vmem>>, vector<1x1x1xf32>,
    } else {
    }
    return
  }
  func.func @transform_0(%arg0: i32, %arg1: i32) -> (i32, i32, i32) {
    %c0_i32 = arith.constant 0 : i32
    %c0_i32_0 = arith.constant 0 : i32
    return %arg0, %arg1, %c0_i32 : i32, i32, i32
  }
  func.func @transform_1(%arg0: i32, %arg1: i32) -> (i32, i32, i32) {
    %c0_i32 = arith.constant 0 : i32
    %c0_i32_0 = arith.constant 0 : i32
    %c0_i32_1 = arith.constant 0 : i32
    return %arg0, %c0_i32, %c0_i32_0 : i32, i32, i32
  }
  func.func @transform_2(%arg0: i32, %arg1: i32) -> (i32, i32, i32) {
    %c0_i32 = arith.constant 0 : i32
    %c0_i32_0 = arith.constant 0 : i32
    %c0_i32_1 = arith.constant 0 : i32
    return %arg0, %c0_i32, %c0_i32_0 : i32, i32, i32
  }
  func.func @transform_3(%arg0: i32, %arg1: i32) -> (i32, i32, i32) {
    %c0_i32 = arith.constant 0 : i32
    %c0_i32_0 = arith.constant 0 : i32
    %c0_i32_1 = arith.constant 0 : i32
    return %arg0, %c0_i32, %c0_i32_0 : i32, i32, i32
  }
}

</mosaic_0001>

<bundles_post_ra>
// kernel: tpu_custom_call.1
= control target key start
LH: loop header
LB: loop body
LE: loop exit
PB: predicated region body
PF: predicated region fallthrough
CT: control target
= control target key end

     0   :  { %s2507_s12 = smov 0   ;;  %s2509_s13 = smov 0   ;;  %s2641_s0 = inlined_call_operand.vmem [shape: f32[2,8,4], index: 0, kind: input, shape index: {}]   ;;  %s2642_s1 = inlined_call_operand.vmem [shape: f32[2,16,4], index: 1, kind: input, shape index: {}]   ;;  %s2643_s2 = inlined_call_operand.vmem [shape: f32[2,1,16], index: 2, kind: input, shape index: {}]   ;;  %s2644_s3 = inlined_call_operand.vmem [shape: f32[2,1,1], index: 3, kind: output, shape index: {}]  }
   0x1   :  { %s2511_s14 = smov 0  }
   0x2 LB: > { %s25_s15 = sadd.s32 1, %s2475_s13  ;;  %p2166_p0 = scmp.ge.s32.totalorder %s2479_s14, 1  ;;  %s2479_s14 = sphi %s2511_s14, %s13_s14   ;;  %s2475_s13 = sphi %s2509_s13, %s2646_s13   ;;  %s2471_s12 = sphi %s2507_s12, %s2645_s12  }
   0x3   : > { %p27_p1 = scmp.ge.s32.totalorder %s25_s15, 2  ;;  %p171_p2 = scmp.lt.s32.totalorder %s2479_s14, 3 }
   0x5   : > { %s2648_s15 = smov (%p27_p1, %s25_s15), 0  ;;  %p172_p3 = pnand %p2166_p0, %p171_p2 }
   0x6   : > { %p203_p4 = scmp.lt.s32.totalorder (!%p172_p3), %s2471_s12, 1  ;;  %v2481_v0 = vmov (!%p172_p3), 0.0|0.0   ;;  %vm2482_vm0 = vmmov (!%p172_p3), 0   ;;  %v2483_v1 = vmov (!%p172_p3), 0.0   ;;  %vm231_vm1 = vcmask (!%p172_p3), 31744  }
   0x7   : > { %175 = sbr.rel (%p172_p3) target bundleno = 1265 (0x4f1), region = 32  ;;  %2375 = vmatprep.subr.bf16.mxu0 (!%p172_p3), %v2481_v0  ;;  %2241 = vmatprep.mubr.msk.f32.mxu0 (!%p172_p3), %vm2482_vm0, %v2483_v1  ;;  %vm715_vm2 = vcmask (!%p172_p3), 130048   ;;  %v2484_v38 = vmov (!%p172_p3), 1.0|1.0   ;;  %v2485_v49 = vmov (!%p172_p3), 0   ;;  %vm1168_vm3 = vcmask (!%p172_p3), 64512  }
   0x8   : > { %2393 = vmatprep.subr.bf16.mxu1 (!%p172_p3), %v2481_v0  ;;  %2283 = vmatprep.mubr.msk.f32.mxu1 (!%p172_p3), %vm2482_vm0, %v2483_v1  ;;  %v1170_v54 = vsel (!%p172_p3), %vm1168_vm3, 1.0, %v2485_v49  ;;  %vm225_vm4 = vcmask (!%p172_p3), 122880   ;;  %vm2081_vm5 = vcmask (!%p172_p3), 0  }
   0x9   : > { %2394 = vmatpush3.bf16.msra.mxu1 (!%p172_p3), %v2484_v38  ;;  %2449 = vset.pattern.permute.xlu1 (!%p172_p3), %v2485_v49  ;;  %v1239_v55 = vsub.f32 (!%p172_p3), %v1170_v54, %v1170_v54  ;;  %226 = vst.msk [vmem:[#allocation2] sm:$0x1] (!%p172_p3), %vm225_vm4, %v2483_v1  ;;  %227 = vst.msk [vmem:[#allocation3] sm:$0x1] (!%p172_p3), %vm225_vm4, %v2483_v1 }
   0xa   : > { %2286 = vmatprep.subr.mxu1 (!%p172_p3), %v2483_v1  ;;  %2450 = vset.pattern.permute.xlu0 (!%p172_p3), %v2485_v49 }
   0xb   : > { %v1240_v56 = vand.u32 (!%p172_p3), 4294901760, %v1239_v55 }
   0xd   : > { %v1241_v57 = vsub.f32 (!%p172_p3), %v1239_v55, %v1240_v56 }
   0xe   : > { %s2650_s12 = smov (!%p203_p4, %s2471_s12), 1 }
   0xf   : > { %s2179_s16 = sshll.u32 %s2650_s12, 4  ;;  %s2167_s17 = sshll.u32 %s2650_s12, 3  ;;  %v1242_v60 = vand.u32 4294901760, %v1241_v57 }
  0x10   : > { %s214_s20 = scalar_lea.vmem %s2642_s1, %s2179_s16  ;;  %s209_s23 = scalar_lea.vmem %s2641_s0, %s2167_s17 }
  0x11   : > { %v229_v2 = vld [vmem:[%s214_s20] sm:$0xff]  ;;  %v230_v3 = vld [vmem:[%s214_s20 + $0x8] sm:$0xff]  ;;  %s217_s26 = scalar_lea.vmem %s2643_s2, %s2650_s12  ;;  %s220_s29 = scalar_lea.vmem %s2644_s3, %s2650_s12 }
  0x12   : > { %v228_v4 = vld [vmem:[%s209_s23] sm:$0xff]  ;;  %v236_v5 = vsel %vm231_vm1, %v229_v2, 0  ;;  %v239_v6 = vsel %vm231_vm1, %v230_v3, 0 }
  0x13   : > { %v233_v7 = vsel %vm231_vm1, %v228_v4, 0  ;;  %v700_v8 = vmul.f32 %v228_v4, %v228_v4  ;;  %v242_v9 = vand.u32 4294901760, %v236_v5  ;;  %v245_v10 = vand.u32 4294901760, %v239_v6  ;;  %v2170_v33 = vld [vmem:[%s217_s26] ss:$0 sm:$0xff] }
  0x14   : > { %v308_v11 = vand.u32 4294901760, %v233_v7 }
  0x15   : > { %v701_v12 = vsel %vm231_vm1, %v700_v8, 0.0  ;;  %v2376_v13 = vpack.c.bf16 %v245_v10, %v242_v9  ;;  %v320_v14 = vsub.f32 %v236_v5, %v242_v9  ;;  %v327_v15 = vsub.f32 %v239_v6, %v245_v10 }
  0x16   : > { %v309_v16 = vsub.f32 %v233_v7, %v308_v11  ;;  %702 = vadd.xlane.f32.xlu0 %v701_v12  ;;  %v2486_v7 = vmov 1.0  }
  0x17   : > { %2377 = vmatpush3.bf16.xpose.msra.mxu0 %v2376_v13  ;;  %v321_v18 = vand.u32 4294901760, %v320_v14  ;;  %v328_v19 = vand.u32 4294901760, %v327_v15  ;;  %v2382_v27 = vpack.c.bf16 %v327_v15, %v320_v14 }
  0x18   : > { %v310_v17 = vand.u32 4294901760, %v309_v16  ;;  %2378 = vmatprep.subr.bf16.mxu0 %v2481_v0 }
  0x19   : > { %v322_v21 = vsub.f32 %v320_v14, %v321_v18  ;;  %v329_v22 = vsub.f32 %v327_v15, %v328_v19  ;;  %v2388_v28 = vpack.c.bf16 %v328_v19, %v321_v18 }
  0x1a   : > { %v311_v20 = vsub.f32 %v309_v16, %v310_v17 }
  0x1b   : > { %v323_v24 = vand.u32 4294901760, %v322_v21  ;;  %v330_v25 = vand.u32 4294901760, %v329_v22 }
  0x1c   : > { %v312_v23 = vand.u32 4294901760, %v311_v20 }
  0x1d   : > { %v2379_v26 = vpack.c.bf16 %v330_v25, %v323_v24 }
  0x1e   : > { %2242 = vmatmul.mubr.f32.vlgmr.msra.gmra.mrb[0].mxu0 %v312_v23 }
  0x1f   : > { %2380 = vmatpush3.bf16.xpose.msra.mxu0 %v2379_v26  ;;  %2248 = vmatprep.mubr.msk.f32.mxu0 %vm2482_vm0, %v2483_v1 }
  0x20   : > { %2381 = vmatprep.subr.bf16.mxu0 %v2481_v0 }
  0x26   : > { %2249 = vmatmul.mubr.f32.vlgmr.msra.gmra.mrb[0].mxu0 %v308_v11 }
  0x27   : > { %2383 = vmatpush3.bf16.xpose.msra.mxu0 %v2382_v27  ;;  %2255 = vmatprep.mubr.msk.f32.mxu0 %vm2482_vm0, %v2483_v1 }
  0x28   : > { %2384 = vmatprep.subr.bf16.mxu0 %v2481_v0 }
  0x2e   : > { %2256 = vmatmul.mubr.f32.vlgmr.msra.gmra.mrb[0].mxu0 %v309_v16 }
  0x2f   : > { %2386 = vmatpush3.bf16.xpose.msra.mxu0 %v2376_v13  ;;  %2262 = vmatprep.mubr.msk.f32.mxu0 %vm2482_vm0, %v2483_v1 }
  0x30   : > { %2387 = vmatprep.subr.bf16.mxu0 %v2481_v0 }
  0x36   : > { %2263 = vmatmul.mubr.f32.vlgmr.msra.gmra.mrb[0].mxu0 %v310_v17 }
  0x37   : > { %2389 = vmatpush3.bf16.xpose.msra.mxu0 %v2388_v28  ;;  %2269 = vmatprep.mubr.msk.f32.mxu0 %vm2482_vm0, %v2483_v1 }
  0x38   : > { %2390 = vmatprep.subr.bf16.mxu0 %v2481_v0 }
  0x3e   : > { %2270 = vmatmul.mubr.f32.vlgmr.msra.gmra.mrb[0].mxu0 %v308_v11 }
  0x3f   : > { %2392 = vmatpush3.bf16.xpose.msra.mxu0 %v2376_v13  ;;  %2276 = vmatprep.mubr.msk.f32.mxu0 %vm2482_vm0, %v2483_v1 }
  0x40   : > { %2345 = vmatprep.subr.mxu0 %v2483_v1 }
  0x46   : > { %2277 = vmatmul.mubr.f32.vlgmr.msra.gmra.mrb[0].mxu0 %v308_v11 }
  0x47   : > { %2347 = vmatprep.mubr.msk.f32.mxu0 %vm2482_vm0, %v2483_v1 }
  0xa3   : > { %v703_v30 = vpop.xlane.xlu0 %702 }
 0x119   : > { %v696_v29 = vpop.f32.mrb[0].mxu0 }
 0x11a   : > { %v705_v31 = vmul.f32 2.0, %v696_v29  ;;  %v2278_v32 = vpop.f32.mrb[1].mxu0  ;;  %v1167_v29 = vld [vmem:[#allocation2] sm:$0x1] }
 0x11c   : > { %v706_v34 = vsub.f32 %v705_v31, %v703_v30 }
 0x11e   : > { %v713_v35 = vsub.f32 %v706_v34, %v2170_v33 }
 0x120   : > { %v714_v36 = vmin.f32 %v713_v35, 0.0 }
 0x122   : > { %v716_v37 = vsel %vm715_vm2, %v714_v36, -inf }
 0x123   : > { %717 = vmax.xlane.f32.xlu0 %v716_v37 }
 0x1b0   : > { %v718_v39 = vpop.xlane.xlu0 %717 }
 0x1b1   : > { %v719_v40 = vsub.f32 %v714_v36, %v718_v39 }
 0x1b3   : > { %v720_v41 = vmul.f32 1.442695, %v719_v40 }
 0x1b5   : > { %2451 = vpow2.f32 %v720_v41 }
 0x1bf   : > { %v2452_v42 = vpop.eup %2451 }
 0x1c0   : > { %v723_v43 = vsel %vm715_vm2, %v2452_v42, 0 }
 0x1c1   : > { %v790_v44 = vand.u32 4294901760, %v723_v43 }
 0x1c3   : > { %v791_v45 = vsub.f32 %v723_v43, %v790_v44 }
 0x1c5   : > { %v792_v46 = vand.u32 4294901760, %v791_v45 }
 0x1c7   : > { %v793_v47 = vsub.f32 %v791_v45, %v792_v46 }
 0x1c9   : > { %v794_v48 = vand.u32 4294901760, %v793_v47 }
 0x1cb   : > { %2284 = vmatmul.mubr.f32.vlgmr.msra.gmra.mrb[0].mxu1 %v794_v48 }
 0x1cc   : > { %2287 = vmatpush3.msra.mxu1 %v2483_v1  ;;  %2288 = vmatprep.mubr.msk.f32.mxu1 %vm2482_vm0, %v2483_v1 }
 0x1cd   : > { %2291 = vmatprep.subr.mxu1 %v2483_v1 }
 0x1d3   : > { %2289 = vmatmul.mubr.f32.vlgmr.msra.gmra.mrb[0].mxu1 %v790_v44 }
 0x1d4   : > { %2292 = vmatpush3.msra.mxu1 %v2483_v1  ;;  %2293 = vmatprep.mubr.msk.f32.mxu1 %vm2482_vm0, %v2483_v1 }
 0x1d5   : > { %2395 = vmatprep.subr.bf16.mxu1 %v2481_v0 }
 0x1db   : > { %2294 = vmatmul.mubr.f32.vlgmr.msra.gmra.mrb[0].mxu1 %v791_v45 }
 0x1dc   : > { %2396 = vmatpush3.bf16.msra.mxu1 %v2484_v38  ;;  %2300 = vmatprep.mubr.msk.f32.mxu1 %vm2482_vm0, %v2483_v1 }
 0x1dd   : > { %2303 = vmatprep.subr.mxu1 %v2483_v1 }
 0x1e3   : > { %2301 = vmatmul.mubr.f32.vlgmr.msra.gmra.mrb[0].mxu1 %v792_v46 }
 0x1e4   : > { %2304 = vmatpush3.msra.mxu1 %v2483_v1  ;;  %2305 = vmatprep.mubr.msk.f32.mxu1 %vm2482_vm0, %v2483_v1 }
 0x1e5   : > { %2397 = vmatprep.subr.bf16.mxu1 %v2481_v0 }
 0x1eb   : > { %2306 = vmatmul.mubr.f32.vlgmr.msra.gmra.mrb[0].mxu1 %v790_v44 }
 0x1ec   : > { %2398 = vmatpush3.bf16.msra.mxu1 %v2484_v38  ;;  %2312 = vmatprep.mubr.msk.f32.mxu1 %vm2482_vm0, %v2483_v1 }
 0x1ed   : > { %2315 = vmatprep.subr.mxu1 %v2483_v1 }
 0x1f3   : > { %2313 = vmatmul.mubr.f32.vlgmr.msra.gmra.mrb[0].mxu1 %v790_v44 }
 0x1f4   : > { %2317 = vmatprep.mubr.msk.f32.mxu1 %vm2482_vm0, %v2483_v1 }
 0x2c6   : > { %v1154_v50 = vpop.f32.mrb[0].mxu1 }
 0x2c7   : > { %2453 = vrcp.f32 %v1154_v50  ;;  %v2314_v51 = vpop.f32.mrb[1].mxu1 }
 0x2d1   : > { %v2454_v52 = vpop.eup %2453 }
 0x2d2   : > { %v1159_v53 = vmul.f32 0.125, %v2454_v52 }
 0x2d4   : > { %1162 = vperm.xlu1 %2449, %v1159_v53  }
 0x353   : > { %v1163_v58 = vpop.permute.xlu1 %1162 }
 0x354   : > { %v1165_v59 = vmul.f32 %v2452_v42, %v1163_v58  ;;  %v1621_v42 = vld [vmem:[#allocation3] sm:$0x1] }
 0x356   : > { %v1166_v61 = vmul.f32 %v1165_v59, %v714_v36  ;;  %v1173_v62 = vand.u32 4294901760, %v1165_v59 }
 0x358   : > { %v1250_v63 = vsub.f32 %v1165_v59, %v1173_v62  ;;  %v1623_v0 = vand.u32 4294901760, %v1166_v61  ;;  %2316 = vmatpush3.msra.mxu1 %v1173_v62 }
 0x359   : > { %2318 = vmatmul.mubr.f32.vlgmr.msra.gmra.mrb[2].mxu1 %v1242_v60  ;;  %2320 = vmatprep.subr.mxu1 %v2483_v1 }
 0x35a   : > { %v1251_v2 = vand.u32 4294901760, %v1250_v63  ;;  %v1700_v3 = vsub.f32 %v1166_v61, %v1623_v0  ;;  %2346 = vmatpush3.msra.mxu0 %v1623_v0  ;;  %2322 = vmatprep.mubr.msk.f32.mxu1 %vm2482_vm0, %v2483_v1 }
 0x35b   : > { %2348 = vmatmul.mubr.f32.vlgmr.msra.gmra.mrb[2].mxu0 %v1242_v60  ;;  %2355 = vmatprep.subr.mxu0 %v2483_v1 }
 0x35c   : > { %2356 = vmatpush3.msra.mxu0 %v1700_v3  ;;  %2357 = vmatprep.mubr.msk.f32.mxu0 %vm2482_vm0, %v2483_v1  ;;  %v1701_v4 = vand.u32 4294901760, %v1700_v3  ;;  %v1252_v5 = vsub.f32 %v1250_v63, %v1251_v2 }
 0x35d   : > { %2365 = vmatprep.subr.mxu0 %v2483_v1 }
 0x35e   : > { %v1253_v6 = vand.u32 4294901760, %v1252_v5  ;;  %v1702_v8 = vsub.f32 %v1700_v3, %v1701_v4 }
 0x35f   : > { %2358 = vmatmul.mubr.f32.vlgmr.msra.gmra.mrb[4].mxu0 %v1239_v55 }
 0x360   : > { %2366 = vmatpush3.msra.mxu0 %v1701_v4  ;;  %2321 = vmatpush3.msra.mxu1 %v1253_v6  ;;  %v1703_v9 = vand.u32 4294901760, %v1702_v8 }
 0x361   : > { %2323 = vmatmul.mubr.msk.f32.vlgmr.msra.gmra.mrb[4].mxu1 %vm1168_vm3, %v2486_v7  ;;  %2325 = vmatprep.subr.mxu1 %v2483_v1 }
 0x362   : > { %2326 = vmatpush3.msra.mxu1 %v1250_v63  ;;  %2327 = vmatprep.mubr.msk.f32.mxu1 %vm2482_vm0, %v2483_v1 }
 0x363   : > { %2330 = vmatprep.subr.mxu1 %v2483_v1  ;;  %2367 = vmatprep.mubr.msk.f32.mxu0 %vm2482_vm0, %v2483_v1 }
 0x364   : > { %2368 = vmatmul.mubr.msk.f32.vlgmr.msra.gmra.mrb[6].mxu0 %vm1168_vm3, %v2486_v7 }
 0x365   : > { %2328 = vmatmul.mubr.f32.vlgmr.msra.gmra.mrb[6].mxu1 %v1239_v55 }
 0x366   : > { %2331 = vmatpush3.msra.mxu1 %v1173_v62  ;;  %2332 = vmatprep.mubr.msk.f32.mxu1 %vm2482_vm0, %v2483_v1 }
 0x367   : > { %2335 = vmatprep.subr.mxu1 %v2483_v1 }
 0x369   : > { %2333 = vmatmul.mubr.f32.vlgmr.msra.gmra.mrb[8].mxu1 %v1240_v56 }
 0x36a   : > { %2336 = vmatpush3.msra.mxu1 %v1251_v2  ;;  %2337 = vmatprep.mubr.msk.f32.mxu1 %vm2482_vm0, %v2483_v1 }
 0x36b   : > { %2340 = vmatprep.subr.mxu1 %v2483_v1 }
 0x36d   : > { %2338 = vmatmul.mubr.msk.f32.vlgmr.msra.gmra.mrb[10].mxu1 %vm1168_vm3, %v2486_v7 }
 0x36e   : > { %2341 = vmatpush3.msra.mxu1 %v1173_v62  ;;  %2342 = vmatprep.mubr.msk.f32.mxu1 %vm2482_vm0, %v2483_v1 }
 0x36f   : > { %2350 = vmatprep.subr.mxu1 %v2483_v1 }
 0x371   : > { %2343 = vmatmul.mubr.msk.f32.vlgmr.msra.gmra.mrb[12].mxu1 %vm1168_vm3, %v2486_v7 }
 0x372   : > { %2351 = vmatpush3.msra.mxu1 %v1703_v9  ;;  %2352 = vmatprep.mubr.msk.f32.mxu1 %vm2482_vm0, %v2483_v1 }
 0x373   : > { %2360 = vmatprep.subr.mxu1 %v2483_v1 }
 0x375   : > { %2353 = vmatmul.mubr.msk.f32.vlgmr.msra.gmra.mrb[14].mxu1 %vm1168_vm3, %v2486_v7 }
 0x376   : > { %2361 = vmatpush3.msra.mxu1 %v1623_v0  ;;  %2362 = vmatprep.mubr.msk.f32.mxu1 %vm2482_vm0, %v2483_v1 }
 0x377   : > { %2370 = vmatprep.subr.mxu1 %v2483_v1 }
 0x379   : > { %2363 = vmatmul.mubr.f32.vlgmr.msra.gmra.mrb[16].mxu1 %v1240_v56 }
 0x37a   : > { %2371 = vmatpush3.msra.mxu1 %v1623_v0  ;;  %2372 = vmatprep.mubr.msk.f32.mxu1 %vm2482_vm0, %v2483_v1 }
 0x37d   : > { %2373 = vmatmul.mubr.msk.f32.vlgmr.msra.gmra.mrb[18].mxu1 %vm1168_vm3, %v2486_v7 }
 0x42c   : > { %v1244_v10 = vpop.f32.mrb[2].mxu1 }
 0x42d   : > { %v2319_v11 = vpop.f32.mrb[3].mxu1 }
 0x42e   : > { %v1694_v12 = vpop.f32.mrb[2].mxu0 }
 0x42f   : > { %v2349_v13 = vpop.f32.mrb[3].mxu0 }
 0x432   : > { %v1844_v14 = vpop.f32.mrb[4].mxu0 }
 0x433   : > { %v2359_v15 = vpop.f32.mrb[5].mxu0 }
 0x434   : > { %v1320_v16 = vpop.f32.mrb[4].mxu1 }
 0x435   : > { %v1321_v17 = vadd.f32 %v1320_v16, %v1244_v10  ;;  %v2324_v18 = vpop.f32.mrb[5].mxu1 }
 0x437   : > { %v1992_v19 = vpop.f32.mrb[6].mxu0 }
 0x438   : > { %v1394_v20 = vpop.f32.mrb[6].mxu1  ;;  %v2369_v21 = vpop.f32.mrb[7].mxu0 }
 0x439   : > { %v1395_v22 = vadd.f32 %v1394_v20, %v1321_v17  ;;  %v2329_v23 = vpop.f32.mrb[7].mxu1 }
 0x43c   : > { %v1468_v24 = vpop.f32.mrb[8].mxu1 }
 0x43d   : > { %v1469_v25 = vadd.f32 %v1468_v24, %v1395_v22  ;;  %v2334_v26 = vpop.f32.mrb[9].mxu1 }
 0x440   : > { %v1542_v27 = vpop.f32.mrb[10].mxu1 }
 0x441   : > { %v1543_v28 = vadd.f32 %v1542_v27, %v1469_v25  ;;  %v2339_v1 = vpop.f32.mrb[11].mxu1 }
 0x444   : > { %v1614_v30 = vpop.f32.mrb[12].mxu1 }
 0x445   : > { %v1615_v31 = vadd.f32 %v1614_v30, %v1543_v28  ;;  %v2344_v32 = vpop.f32.mrb[13].mxu1 }
 0x447   : > { %v1618_v33 = vadd.f32 %v1615_v31, %v1167_v29 }
 0x448   : > { %v1770_v34 = vpop.f32.mrb[14].mxu1 }
 0x449   : > { %1620 = vst.msk [vmem:[#allocation2] sm:$0x1] %vm225_vm4, %v1618_v33  ;;  %v1771_v35 = vadd.f32 %v1770_v34, %v1694_v12  ;;  %v2354_v36 = vpop.f32.mrb[15].mxu1 }
 0x44b   : > { %v1845_v37 = vadd.f32 %v1844_v14, %v1771_v35 }
 0x44c   : > { %v1918_v38 = vpop.f32.mrb[16].mxu1 }
 0x44d   : > { %v1919_v39 = vadd.f32 %v1918_v38, %v1845_v37  ;;  %v2364_v40 = vpop.f32.mrb[17].mxu1 }
 0x44f   : > { %v1993_v41 = vadd.f32 %v1992_v19, %v1919_v39 }
 0x450   : > { %v2064_v43 = vpop.f32.mrb[18].mxu1  ;;  %v2074_v44 = vld [vmem:[#allocation2] sm:$0x1] }
 0x451   : > { %v2065_v45 = vadd.f32 %v2064_v43, %v1993_v41  ;;  %v2374_v46 = vpop.f32.mrb[19].mxu1  ;;  %2455 = vrcp.f32 %v2074_v44 }
 0x453   : > { %v2068_v47 = vadd.f32 %v2065_v45, %v1621_v42 }
 0x455   : > { %2069 = vst.msk [vmem:[#allocation3] sm:$0x1] %vm225_vm4, %v2068_v47 }
 0x45b   : > { %v2456_v48 = vpop.eup %2455 }
 0x45c   : > { %v2073_v49 = vld [vmem:[#allocation3] sm:$0x1] }
 0x45d   : > { %v2076_v50 = vmul.f32 %v2456_v48, %v2073_v49 }
 0x45f   : > { %v2077_v51 = vsel %vm225_vm4, %v2076_v50, 0.0 }
 0x460   : > { %2078 = vadd.xlane.f32.xlu1 %v2077_v51 }
 0x4ed   : > { %v2079_v52 = vpop.xlane.xlu1 %2078 }
 0x4ee   : > { %v2080_v53 = vmul.f32 -0.0625, %v2079_v52 }
 0x4f0   : > { %2082 = vst.msk [vmem:[%s220_s29] sm:$0x1] %vm2081_vm5, %v2080_v53 }
 0x4f1 PF: > { %s13_s14 = sadd.s32 1, %s2479_s14   ;;  %s2645_s12 = smov %s2475_s13 }
 0x4f2   : > { %p10_p5 = scmp.ge.s32.totalorder %s13_s14, 4   ;;  %s2646_s13 = smov %s2648_s15 }
 0x4f4   :  { %12 = sbr.rel (!%p10_p5) target bundleno = 2 (0x2), region = 76 }

</bundles_post_ra>
